<compile_context>
chip_gen: v5e
topology: v5e:2x2
jax: 0.10.0
libtpu: 0.0.40
codegen_flags: <defaults>
</compile_context>

<pallas_src>
import functools

import jax
import jax.numpy as jnp
from jax.experimental import pallas as pl
from jax.experimental.pallas import tpu as pltpu


# ------------------------------ tiling helpers --------------------------------
def _round_up(x, m):
    return m * (-(-x // m))


def _vmem_budget_bytes():
    """Per-generation VMEM budget (leave headroom under the physical capacity)."""
    try:
        cap = pltpu.get_tpu_info().vmem_capacity_bytes
    except Exception:
        cap = 64 * 1024 * 1024          # conservative default (v7x physical VMEM)
    return int(cap * 3 // 4)


def _expert_footprint(tm, th, D, E, w_bytes=2, x_bytes=2, out_bytes=4):
    """Approximate per-step VMEM footprint of the expert kernel (bytes)."""
    wts = 2 * 2 * D * th * w_bytes                  # W1 + W2 chunks, double-buffered
    res = 2 * tm * D * x_bytes                      # x tile
    res += 2 * tm * E * 4                           # combine weights
    res += 2 * (th + D) * 4                         # biases
    res += 2 * tm * D * out_bytes                   # output tile
    res += tm * D * 4 + tm * 128 * 4                # f32 accumulator + w_e scratch
    return wts + res


def _expert_tiles(N, D, H, E, tm_req):
    """Pick (token tile, hidden chunk, vmem budget) for the expert kernel."""
    budget = _vmem_budget_bytes()
    # Token tile: as large as requested, but avoid huge padding for tiny N and
    # keep >= 2 tiles when the batch allows (feeds both TensorCores on v7x).
    tm = max(8, min(tm_req, _round_up(max(N, 1), 128)))
    while tm > 128 and _round_up(N, tm) // tm < 2:
        tm //= 2
    # Hidden chunk: full H when small, otherwise 256-aligned (2x256^2 MXU on
    # v6e/v7x), sized against the per-generation VMEM budget.  H is later
    # zero-padded to a multiple of th, which is numerically exact.
    cands = [_round_up(H, 8)] if H <= 512 else [512, 256, 128]
    th = cands[-1]
    for c in cands:
        if _expert_footprint(tm, c, D, E) <= budget:
            th = c
            break
    while _expert_footprint(tm, th, D, E) > budget and tm > 128:
        tm = max(128, tm // 2)
    return tm, th, budget


# --------------------------- expert MoE kernel --------------------------------
def _moe_expert_kernel(active_ref, x_ref, w1_ref, b1_ref, w2_ref, b2_ref, cw_ref,
                       o_ref, acc_ref, w_sc):
    i = pl.program_id(0)
    e = pl.program_id(1)
    hk = pl.program_id(2)
    n_e = pl.num_programs(1)
    n_h = pl.num_programs(2)

    @pl.when(jnp.logical_and(e == 0, hk == 0))
    def _():
        acc_ref[...] = jnp.zeros_like(acc_ref)

    # Skip all MXU / VALU work for experts that no token in this tile selected.
    @pl.when(active_ref[i, e] != 0)
    def _():
        @pl.when(hk == 0)
        def _():
            # Per-token combine weight for expert e, extracted once per (i, e)
            # from the resident lane-dense [tm, E] block and cached in scratch.
            col = jax.lax.broadcasted_iota(jnp.int32, cw_ref.shape, 1)
            w_sc[...] = jnp.sum(
                jnp.where(col == e, cw_ref[...], 0.0), axis=1, keepdims=True)
            # Output bias contributes once per expert (scaled per token).
            acc_ref[...] += w_sc[...] * b2_ref[...]

        # h = relu(x @ W1[e][:, hk-chunk] + b1[e][hk-chunk])  (bf16 MXU, f32 acc)
        h = jnp.dot(x_ref[...], w1_ref[...], preferred_element_type=jnp.float32)
        h = jnp.maximum(h + b1_ref[...], 0.0)
        # Scale the smaller [tm, th] tensor by the combine weight so the
        # accumulator update below is a pure add.
        hs = (w_sc[...] * h).astype(w2_ref.dtype)
        acc_ref[...] += jnp.dot(hs, w2_ref[...],
                                preferred_element_type=jnp.float32)

    @pl.when(jnp.logical_and(e == n_e - 1, hk == n_h - 1))
    def _():
        o_ref[...] = acc_ref[...].astype(o_ref.dtype)


def moe_experts_pallas(active, x_bf, w1, b1, w2, b2, cw, *, tm, th, out_dtype,
                       vmem_limit_bytes):
    """active: [n_tiles, E] int32; x_bf: [Np, D] bf16; w1: [E, D, Hp] bf16;
    b1: [E, 1, Hp] f32; w2: [E, Hp, D] bf16; b2: [E, 1, D] f32; cw: [Np, E] f32."""
    Np, D = x_bf.shape
    E, _, Hp = w1.shape
    grid = (Np // tm, E, Hp // th)
    return pl.pallas_call(
        _moe_expert_kernel,
        out_shape=jax.ShapeDtypeStruct((Np, D), out_dtype),
        grid_spec=pltpu.PrefetchScalarGridSpec(
            num_scalar_prefetch=1,
            grid=grid,
            in_specs=[
                pl.BlockSpec((tm, D), lambda i, e, hk, act: (i, 0)),            # x (resident)
                pl.BlockSpec((None, D, th), lambda i, e, hk, act: (e, 0, hk)),  # W1[e] chunk
                pl.BlockSpec((None, 1, th), lambda i, e, hk, act: (e, 0, hk)),  # b1[e] chunk
                pl.BlockSpec((None, th, D), lambda i, e, hk, act: (e, hk, 0)),  # W2[e] chunk
                pl.BlockSpec((None, 1, D), lambda i, e, hk, act: (e, 0, 0)),    # b2[e]
                pl.BlockSpec((tm, E), lambda i, e, hk, act: (i, 0)),            # combine w
            ],
            out_specs=pl.BlockSpec((tm, D), lambda i, e, hk, act: (i, 0)),
            scratch_shapes=[pltpu.VMEM((tm, D), jnp.float32),   # f32 accumulator
                            pltpu.VMEM((tm, 1), jnp.float32)],  # cached w_e
        ),
        compiler_params=pltpu.CompilerParams(
            dimension_semantics=("parallel", "arbitrary", "arbitrary"),
            vmem_limit_bytes=vmem_limit_bytes),
    )(active, x_bf, w1, b1, w2, b2, cw)


# ------------------------------- full forward ---------------------------------
def moe_forward(x, gate_w, w1, b1, w2, b2, topk, *, tm=256):
    """x: [B, T, D] -> [B, T, D]."""
    B, T, D = x.shape
    E = gate_w.shape[0]
    H = w1.shape[-1]
    N = B * T
    x_flat = x.reshape(N, D)

    # ---- gating: plain JAX (E-wide output; fuses with softmax/top_k) ----
    gate_logits = x_flat @ gate_w.T                                  # [N, E]
    gate_softmax = jax.nn.softmax(gate_logits.astype(jnp.float32), axis=-1)
    # TODO(synk): top-k routing is data-dependent; done with lax.top_k in JAX.
    weights, selected = jax.lax.top_k(gate_softmax, topk)            # [N, k]
    weights = weights / jnp.sum(weights, axis=-1, keepdims=True)

    # dense per-token per-expert combine weights [N, E] (zeros for unselected)
    one_hot = jax.nn.one_hot(selected, E, dtype=jnp.float32)         # [N, k, E]
    cw = jnp.sum(one_hot * weights[..., None], axis=1)               # [N, E] f32

    # ---- tiling / padding ----
    tm_eff, th, vmem_budget = _expert_tiles(N, D, H, E, tm)
    Np = _round_up(N, tm_eff)
    Hp = _round_up(H, th)

    x_bf = x_flat.astype(jnp.bfloat16)
    if Np > N:
        x_bf = jnp.pad(x_bf, ((0, Np - N), (0, 0)))
        cw = jnp.pad(cw, ((0, Np - N), (0, 0)))                      # padded rows -> 0
    w1p = w1.astype(jnp.bfloat16)
    w2p = w2.astype(jnp.bfloat16)
    b1p = b1.astype(jnp.float32)
    b2p = b2.astype(jnp.float32)
    if Hp > H:                                                       # zero-pad: exact
        w1p = jnp.pad(w1p, ((0, 0), (0, 0), (0, Hp - H)))
        b1p = jnp.pad(b1p, ((0, 0), (0, 0), (0, Hp - H)))
        w2p = jnp.pad(w2p, ((0, 0), (0, Hp - H), (0, 0)))

    # per-(token-tile, expert) activity flags -> SMEM scalar prefetch
    n_tiles = Np // tm_eff
    active = (cw.reshape(n_tiles, tm_eff, E) != 0).any(axis=1).astype(jnp.int32)

    out_flat = moe_experts_pallas(active, x_bf, w1p, b1p, w2p, b2p, cw,
                                  tm=tm_eff, th=th, out_dtype=x.dtype,
                                  vmem_limit_bytes=vmem_budget)
    return out_flat[:N].reshape(B, T, D)


# ------------------------------- reference ------------------------------------
def moe_forward_ref(x, gate_w, w1, b1, w2, b2, topk):
    B, T, D = x.shape
    E = gate_w.shape[0]
    x_flat = x.reshape(-1, D)
    logits = x_flat @ gate_w.T
    sm = jax.nn.softmax(logits.astype(jnp.float32), axis=-1)
    w, sel = jax.lax.top_k(sm, topk)
    w = w / jnp.sum(w, axis=-1, keepdims=True)
    out = jnp.zeros_like(x_flat)
    for e in range(E):
        he = jnp.maximum(x_flat @ w1[e] + b1[e], 0.0)
        ye = he @ w2[e] + b2[e]
        we = jnp.sum(jnp.where(sel == e, w, 0.0), axis=-1)
        out = out + we[:, None] * ye
    return out.reshape(B, T, D)


if __name__ == "__main__":
    # small shapes consistent with the module
    B, T = 2, 8
    dmodel = 32          # k_dim == v_dim
    n_experts = 4
    expert_size = 64
    topk = 2
    weight_scale = 1.0

    key = jax.random.PRNGKey(0)
    kx, kg, k1, k2 = jax.random.split(key, 4)

    x = jax.random.normal(kx, (B, T, dmodel), dtype=jnp.float32)

    # deterministic parameter init matching the module's __init__ distributions
    gate_w = 0.02 * jax.random.normal(kg, (n_experts, dmodel), dtype=jnp.float32)
    std = expert_size ** (-0.5) * weight_scale
    w1 = std * jax.random.normal(k1, (n_experts, dmodel, expert_size), dtype=jnp.float32)
    w2 = std * jax.random.normal(k2, (n_experts, expert_size, dmodel), dtype=jnp.float32)
    b1 = jnp.zeros((n_experts, 1, expert_size), dtype=jnp.float32)
    b2 = jnp.zeros((n_experts, 1, dmodel), dtype=jnp.float32)

    fwd = jax.jit(functools.partial(moe_forward, topk=topk))
    out = jax.block_until_ready(fwd(x, gate_w, w1, b1, w2, b2))

    ref = moe_forward_ref(x, gate_w, w1, b1, w2, b2, topk)
    assert out.shape == (B, T, dmodel)
    # bf16 MXU matmuls with f32 accumulation -> looser tolerance than pure f32
    assert jnp.allclose(out, ref, atol=3e-2, rtol=3e-2), "mismatch vs reference"

    print("KERNEL_OK")
</pallas_src>

<mosaic_0001>
module attributes {stable_mosaic.version = 11 : i64} {
  func.func @_moe_expert_kernel(%arg0: i32, %arg1: i32, %arg2: i32, %arg3: memref<1x4xi32, #tpu.memory_space<smem>>, %arg4: memref<128x32xbf16, #tpu.memory_space<vmem>>, %arg5: memref<1x32x64xbf16, #tpu.memory_space<vmem>>, %arg6: memref<1x1x64xf32, #tpu.memory_space<vmem>>, %arg7: memref<1x64x32xbf16, #tpu.memory_space<vmem>>, %arg8: memref<1x1x32xf32, #tpu.memory_space<vmem>>, %arg9: memref<128x4xf32, #tpu.memory_space<vmem>>, %arg10: memref<128x32xf32, #tpu.memory_space<vmem>>, %arg11: memref<128x32xf32, #tpu.memory_space<vmem>>, %arg12: memref<128x1xf32, #tpu.memory_space<vmem>>) attributes {dimension_semantics = [#tpu.dimension_semantics<parallel>, #tpu.dimension_semantics<arbitrary>, #tpu.dimension_semantics<arbitrary>], iteration_bounds = array<i64: 1, 4, 1>, scalar_prefetch = 1 : i64, scratch_operands = 2 : i64, tpu.core_type = #tpu.core_type<tc>, window_params = [{transform_indices = @transform_0, window_bounds = array<i64: 128, 32>}, {transform_indices = @transform_1, window_bounds = array<i64: 1, 32, 64>}, {transform_indices = @transform_2, window_bounds = array<i64: 1, 1, 64>}, {transform_indices = @transform_3, window_bounds = array<i64: 1, 64, 32>}, {transform_indices = @transform_4, window_bounds = array<i64: 1, 1, 32>}, {transform_indices = @transform_5, window_bounds = array<i64: 128, 4>}, {transform_indices = @transform_6, window_bounds = array<i64: 128, 32>}]} {
    %c0_i32 = arith.constant 0 : i32
    %0 = arith.cmpi eq, %arg1, %c0_i32 : i32
    %c0_i32_0 = arith.constant 0 : i32
    %1 = arith.cmpi eq, %arg2, %c0_i32_0 : i32
    %2 = arith.andi %0, %1 : i1
    %3 = arith.extui %2 : i1 to i32
    %c0_i32_1 = arith.constant 0 : i32
    %4 = arith.cmpi ne, %3, %c0_i32_1 : i32
    scf.if %4 {
      %cst = arith.constant 0.000000e+00 : f32
      %16 = vector.broadcast %cst : f32 to vector<128x32xf32>
      %c0 = arith.constant 0 : index
      %c0_6 = arith.constant 0 : index
      %17 = vector.load %arg11[%c0, %c0_6] : memref<128x32xf32, #tpu.memory_space<vmem>>, vector<128x32xf32>
      tpu.vector_store %arg11[%c0, %c0_6], %16 {strides = array<i32>} : memref<128x32xf32, #tpu.memory_space<vmem>>, vector<128x32xf32>,
    } else {
    }
    %5 = arith.index_cast %arg0 : i32 to index
    %6 = arith.index_cast %arg1 : i32 to index
    %7 = memref.load %arg3[%5, %6] : memref<1x4xi32, #tpu.memory_space<smem>>
    %c0_i32_2 = arith.constant 0 : i32
    %8 = arith.cmpi ne, %7, %c0_i32_2 : i32
    %9 = arith.extui %8 : i1 to i32
    %c0_i32_3 = arith.constant 0 : i32
    %10 = arith.cmpi ne, %9, %c0_i32_3 : i32
    scf.if %10 {
      %c0_i32_6 = arith.constant 0 : i32
      %16 = arith.cmpi eq, %arg2, %c0_i32_6 : i32
      %17 = arith.extui %16 : i1 to i32
      %c0_i32_7 = arith.constant 0 : i32
      %18 = arith.cmpi ne, %17, %c0_i32_7 : i32
      scf.if %18 {
        %39 = tpu.iota {dimensions = array<i32: 1>} : vector<128x4xi32>
        %40 = vector.broadcast %arg1 : i32 to vector<128x4xi32>
        %41 = arith.cmpi eq, %39, %40 : vector<128x4xi32>
        %c0_26 = arith.constant 0 : index
        %c0_27 = arith.constant 0 : index
        %42 = vector.load %arg9[%c0_26, %c0_27] : memref<128x4xf32, #tpu.memory_space<vmem>>, vector<128x4xf32>
        %cst_28 = arith.constant 0.000000e+00 : f32
        %43 = vector.broadcast %cst_28 : f32 to vector<128x4xf32>
        %44 = arith.select %41, %42, %43 : vector<128x4xi1>, vector<128x4xf32>
        %cst_29 = arith.constant dense<0.000000e+00> : vector<128xf32>
        %45 = vector.multi_reduction <add>, %44, %cst_29 [1] : vector<128x4xf32> to vector<128xf32>
        %46 = vector.shape_cast %45 : vector<128xf32> to vector<128x1xf32>
        %c0_30 = arith.constant 0 : index
        %c0_31 = arith.constant 0 : index
        %47 = vector.load %arg12[%c0_30, %c0_31] : memref<128x1xf32, #tpu.memory_space<vmem>>, vector<128x1xf32>
        tpu.vector_store %arg12[%c0_30, %c0_31], %46 {strides = array<i32>} : memref<128x1xf32, #tpu.memory_space<vmem>>, vector<128x1xf32>,
        %c0_32 = arith.constant 0 : index
        %c0_33 = arith.constant 0 : index
        %48 = vector.load %arg11[%c0_32, %c0_33] : memref<128x32xf32, #tpu.memory_space<vmem>>, vector<128x32xf32>
        %c0_34 = arith.constant 0 : index
        %c0_35 = arith.constant 0 : index
        %49 = vector.load %arg12[%c0_34, %c0_35] : memref<128x1xf32, #tpu.memory_space<vmem>>, vector<128x1xf32>
        %c0_36 = arith.constant 0 : index
        %c0_37 = arith.constant 0 : index
        %c0_38 = arith.constant 0 : index
        %50 = vector.load %arg8[%c0_36, %c0_37, %c0_38] : memref<1x1x32xf32, #tpu.memory_space<vmem>>, vector<1x1x32xf32>
        %51 = vector.shape_cast %50 : vector<1x1x32xf32> to vector<1x32xf32>
        %52 = vector.broadcast %49 : vector<128x1xf32> to vector<128x32xf32>
        %53 = vector.broadcast %51 : vector<1x32xf32> to vector<128x32xf32>
        %54 = arith.mulf %52, %53 : vector<128x32xf32>
        %55 = arith.addf %48, %54 : vector<128x32xf32>
        %c0_39 = arith.constant 0 : index
        %c0_40 = arith.constant 0 : index
        %56 = vector.load %arg11[%c0_39, %c0_40] : memref<128x32xf32, #tpu.memory_space<vmem>>, vector<128x32xf32>
        tpu.vector_store %arg11[%c0_39, %c0_40], %55 {strides = array<i32>} : memref<128x32xf32, #tpu.memory_space<vmem>>, vector<128x32xf32>,
      } else {
      }
      %c0 = arith.constant 0 : index
      %c0_8 = arith.constant 0 : index
      %19 = vector.load %arg4[%c0, %c0_8] : memref<128x32xbf16, #tpu.memory_space<vmem>>, vector<128x32xbf16>
      %c0_9 = arith.constant 0 : index
      %c0_10 = arith.constant 0 : index
      %c0_11 = arith.constant 0 : index
      %20 = vector.load %arg5[%c0_9, %c0_10, %c0_11] : memref<1x32x64xbf16, #tpu.memory_space<vmem>>, vector<1x32x64xbf16>
      %21 = vector.shape_cast %20 : vector<1x32x64xbf16> to vector<32x64xbf16>
      %cst = arith.constant dense<0.000000e+00> : vector<128x64xf32>
      %22 = tpu.matmul %19, %21, %cst {dimension_numbers = #tpu.dot_dimension_numbers<[1], [0], [0], [1], [0, 0, 1, 1], [], []>} : vector<128x32xbf16>, vector<32x64xbf16>, vector<128x64xf32> -> vector<128x64xf32>
      %c0_12 = arith.constant 0 : index
      %c0_13 = arith.constant 0 : index
      %c0_14 = arith.constant 0 : index
      %23 = vector.load %arg6[%c0_12, %c0_13, %c0_14] : memref<1x1x64xf32, #tpu.memory_space<vmem>>, vector<1x1x64xf32>
      %24 = vector.shape_cast %23 : vector<1x1x64xf32> to vector<1x64xf32>
      %25 = vector.broadcast %24 : vector<1x64xf32> to vector<128x64xf32>
      %26 = arith.addf %22, %25 : vector<128x64xf32>
      %cst_15 = arith.constant 0.000000e+00 : f32
      %27 = vector.broadcast %cst_15 : f32 to vector<128x64xf32>
      %28 = arith.maximumf %26, %27 : vector<128x64xf32>
      %c0_16 = arith.constant 0 : index
      %c0_17 = arith.constant 0 : index
      %29 = vector.load %arg12[%c0_16, %c0_17] : memref<128x1xf32, #tpu.memory_space<vmem>>, vector<128x1xf32>
      %30 = vector.broadcast %29 : vector<128x1xf32> to vector<128x64xf32>
      %31 = arith.mulf %30, %28 : vector<128x64xf32>
      %32 = arith.truncf %31 : vector<128x64xf32> to vector<128x64xbf16>
      %c0_18 = arith.constant 0 : index
      %c0_19 = arith.constant 0 : index
      %33 = vector.load %arg11[%c0_18, %c0_19] : memref<128x32xf32, #tpu.memory_space<vmem>>, vector<128x32xf32>
      %c0_20 = arith.constant 0 : index
      %c0_21 = arith.constant 0 : index
      %c0_22 = arith.constant 0 : index
      %34 = vector.load %arg7[%c0_20, %c0_21, %c0_22] : memref<1x64x32xbf16, #tpu.memory_space<vmem>>, vector<1x64x32xbf16>
      %35 = vector.shape_cast %34 : vector<1x64x32xbf16> to vector<64x32xbf16>
      %cst_23 = arith.constant dense<0.000000e+00> : vector<128x32xf32>
      %36 = tpu.matmul %32, %35, %cst_23 {dimension_numbers = #tpu.dot_dimension_numbers<[1], [0], [0], [1], [0, 0, 1, 1], [], []>} : vector<128x64xbf16>, vector<64x32xbf16>, vector<128x32xf32> -> vector<128x32xf32>
      %37 = arith.addf %33, %36 : vector<128x32xf32>
      %c0_24 = arith.constant 0 : index
      %c0_25 = arith.constant 0 : index
      %38 = vector.load %arg11[%c0_24, %c0_25] : memref<128x32xf32, #tpu.memory_space<vmem>>, vector<128x32xf32>
      tpu.vector_store %arg11[%c0_24, %c0_25], %37 {strides = array<i32>} : memref<128x32xf32, #tpu.memory_space<vmem>>, vector<128x32xf32>,
    } else {
    }
    %c3_i32 = arith.constant 3 : i32
    %11 = arith.cmpi eq, %arg1, %c3_i32 : i32
    %c0_i32_4 = arith.constant 0 : i32
    %12 = arith.cmpi eq, %arg2, %c0_i32_4 : i32
    %13 = arith.andi %11, %12 : i1
    %14 = arith.extui %13 : i1 to i32
    %c0_i32_5 = arith.constant 0 : i32
    %15 = arith.cmpi ne, %14, %c0_i32_5 : i32
    scf.if %15 {
      %c0 = arith.constant 0 : index
      %c0_6 = arith.constant 0 : index
      %16 = vector.load %arg11[%c0, %c0_6] : memref<128x32xf32, #tpu.memory_space<vmem>>, vector<128x32xf32>
      %c0_7 = arith.constant 0 : index
      %c0_8 = arith.constant 0 : index
      %17 = vector.load %arg10[%c0_7, %c0_8] : memref<128x32xf32, #tpu.memory_space<vmem>>, vector<128x32xf32>
      tpu.vector_store %arg10[%c0_7, %c0_8], %16 {strides = array<i32>} : memref<128x32xf32, #tpu.memory_space<vmem>>, vector<128x32xf32>,
    } else {
    }
    return
  }
  func.func @transform_0(%arg0: i32, %arg1: i32, %arg2: i32, %arg3: memref<1x4xi32, #tpu.memory_space<smem>>) -> (i32, i32) {
    %c0_i32 = arith.constant 0 : i32
    %c0_i32_0 = arith.constant 0 : i32
    return %arg0, %c0_i32 : i32, i32
  }
  func.func @transform_1(%arg0: i32, %arg1: i32, %arg2: i32, %arg3: memref<1x4xi32, #tpu.memory_space<smem>>) -> (i32, i32, i32) {
    %c0_i32 = arith.constant 0 : i32
    %c0_i32_0 = arith.constant 0 : i32
    return %arg1, %c0_i32, %arg2 : i32, i32, i32
  }
  func.func @transform_2(%arg0: i32, %arg1: i32, %arg2: i32, %arg3: memref<1x4xi32, #tpu.memory_space<smem>>) -> (i32, i32, i32) {
    %c0_i32 = arith.constant 0 : i32
    %c0_i32_0 = arith.constant 0 : i32
    return %arg1, %c0_i32, %arg2 : i32, i32, i32
  }
  func.func @transform_3(%arg0: i32, %arg1: i32, %arg2: i32, %arg3: memref<1x4xi32, #tpu.memory_space<smem>>) -> (i32, i32, i32) {
    %c0_i32 = arith.constant 0 : i32
    %c0_i32_0 = arith.constant 0 : i32
    return %arg1, %arg2, %c0_i32 : i32, i32, i32
  }
  func.func @transform_4(%arg0: i32, %arg1: i32, %arg2: i32, %arg3: memref<1x4xi32, #tpu.memory_space<smem>>) -> (i32, i32, i32) {
    %c0_i32 = arith.constant 0 : i32
    %c0_i32_0 = arith.constant 0 : i32
    %c0_i32_1 = arith.constant 0 : i32
    return %arg1, %c0_i32, %c0_i32_0 : i32, i32, i32
  }
  func.func @transform_5(%arg0: i32, %arg1: i32, %arg2: i32, %arg3: memref<1x4xi32, #tpu.memory_space<smem>>) -> (i32, i32) {
    %c0_i32 = arith.constant 0 : i32
    %c0_i32_0 = arith.constant 0 : i32
    return %arg0, %c0_i32 : i32, i32
  }
  func.func @transform_6(%arg0: i32, %arg1: i32, %arg2: i32, %arg3: memref<1x4xi32, #tpu.memory_space<smem>>) -> (i32, i32) {
    %c0_i32 = arith.constant 0 : i32
    %c0_i32_0 = arith.constant 0 : i32
    return %arg0, %c0_i32 : i32, i32
  }
}

</mosaic_0001>

<bundles_post_ra>
// kernel: moe_forward.1
= control target key start
LH: loop header
LB: loop body
LE: loop exit
PB: predicated region body
PF: predicated region fallthrough
CT: control target
= control target key end

     0   :  { %s1519_s27 = smov [#allocation5]   ;;  %s1973_s0 = inlined_call_operand.vmem [shape: s32[1,4], index: 0, kind: input, shape index: {}]   ;;  %s1974_s1 = inlined_call_operand.vmem [shape: bf16[128,32], index: 1, kind: input, shape index: {}]   ;;  %s1975_s2 = inlined_call_operand.vmem [shape: bf16[4,32,64], index: 2, kind: input, shape index: {}]   ;;  %s1976_s3 = inlined_call_operand.vmem [shape: f32[4,1,64], index: 3, kind: input, shape index: {}]   ;;  %s1977_s4 = inlined_call_operand.vmem [shape: bf16[4,64,32], index: 4, kind: input, shape index: {}]   ;;  %s1978_s5 = inlined_call_operand.vmem [shape: f32[4,1,32], index: 5, kind: input, shape index: {}]   ;;  %s1979_s6 = inlined_call_operand.vmem [shape: f32[128,4], index: 6, kind: input, shape index: {}]   ;;  %s1980_s7 = inlined_call_operand.vmem [shape: f32[128,32], index: 7, kind: output, shape index: {}]  }
   0x1   :  { %s13_s26 = sshll.u32 %s1973_s0, 4  ;;  %s14_s26 = int_to_ptr.vmem [resolvable:$true] %s13_s26 }
   0x2   :  { %16 = dma.vmem_to_smem %s14_s26, 16, %s1519_s27, [#allocation4] }
   0x3   :  { %1505 = dma.done.wait [#allocation4], 16 }
   0x4   :  { %1506 = vsyncadd [#allocation4], 4294967280 }
   0x5   :  { %19 = sfence }
   0x6   :  { %s1565_s28 = smov 0   ;;  %s1567_s29 = smov 0  }
   0x7   :  { %s1569_s30 = smov 0  }
   0x8 LB: > { %s40_s0 = sadd.s32 1, %s1513_s29  ;;  %p1340_p0 = scmp.ge.s32.totalorder %s1517_s30, 1  ;;  %s1517_s30 = sphi %s1569_s30, %s25_s30   ;;  %s1513_s29 = sphi %s1567_s29, %s1984_s29   ;;  %s1509_s28 = sphi %s1565_s28, %s1983_s28  }
   0x9   : > { %p42_p1 = scmp.ge.s32.totalorder %s40_s0, 4  ;;  %p305_p2 = scmp.lt.s32.totalorder %s1517_s30, 5 }
   0xb   : > { %s1986_s0 = smov (%p42_p1, %s40_s0), 0  ;;  %p306_p3 = pnand %p1340_p0, %p305_p2 }
   0xc   : > { %p372_p4 = scmp.lt.s32.totalorder (!%p306_p3), %s1509_s28, 3  ;;  %p412_p5 = scmp.eq.s32.totalorder (!%p306_p3), %s1509_s28, 0 }
   0xd   : > { %309 = sbr.rel (%p306_p3) target bundleno = 519 (0x207), region = 44 }
  0x12   : > { %s1588_s8 = scalar_select %p372_p4, %s1509_s28, 3  ;;  %vm418_vm0 = vcmask (%p412_p5), 261120   ;;  %v1520_v0 = vmov (%p412_p5), 0.0  }
  0x13   : > { %417 = sbr.rel (!%p412_p5) target bundleno = 35 (0x23), region = 48  ;;  %419 = vst.msk [vmem:[#allocation2] sm:$0xff] (%p412_p5), %vm418_vm0, %v1520_v0 }
  0x14   : > { %s1425_s9 = sshll.u32 %s1588_s8, 4  ;;  %s385_s12 = scalar_lea.vmem %s1976_s3, %s1588_s8  ;;  %420 = vst.msk [vmem:[#allocation2 + $0x8] sm:$0xff] (%p412_p5), %vm418_vm0, %v1520_v0 }
  0x15   : > { %s1598_s15 = scalar_lea.vmem %s1975_s2, %s1425_s9  ;;  %s1426_s16 = sshll.u32 %s1588_s8, 5  ;;  %421 = vst.msk [vmem:[#allocation2 + $0x10] sm:$0xff] (%p412_p5), %vm418_vm0, %v1520_v0 }
  0x16   : > { %s1604_s19 = scalar_lea.vmem %s1977_s4, %s1426_s16  ;;  %s398_s22 = scalar_lea.vmem %s1978_s5, %s1588_s8  ;;  %422 = vst.msk [vmem:[#allocation2 + $0x18] sm:$0xff] (%p412_p5), %vm418_vm0, %v1520_v0 }
  0x17   : > { %423 = vst.msk [vmem:[#allocation2 + $0x20] sm:$0xff] (%p412_p5), %vm418_vm0, %v1520_v0 }
  0x18   : > { %424 = vst.msk [vmem:[#allocation2 + $0x28] sm:$0xff] %vm418_vm0, %v1520_v0 }
  0x19   : > { %425 = vst.msk [vmem:[#allocation2 + $0x30] sm:$0xff] %vm418_vm0, %v1520_v0 }
  0x1a   : > { %426 = vst.msk [vmem:[#allocation2 + $0x38] sm:$0xff] %vm418_vm0, %v1520_v0 }
  0x1b   : > { %427 = vst.msk [vmem:[#allocation2 + $0x40] sm:$0xff] %vm418_vm0, %v1520_v0 }
  0x1c   : > { %428 = vst.msk [vmem:[#allocation2 + $0x48] sm:$0xff] %vm418_vm0, %v1520_v0 }
  0x1d   : > { %429 = vst.msk [vmem:[#allocation2 + $0x50] sm:$0xff] %vm418_vm0, %v1520_v0 }
  0x1e   : > { %430 = vst.msk [vmem:[#allocation2 + $0x58] sm:$0xff] %vm418_vm0, %v1520_v0 }
  0x1f   : > { %431 = vst.msk [vmem:[#allocation2 + $0x60] sm:$0xff] %vm418_vm0, %v1520_v0 }
  0x20   : > { %432 = vst.msk [vmem:[#allocation2 + $0x68] sm:$0xff] %vm418_vm0, %v1520_v0 }
  0x21   : > { %433 = vst.msk [vmem:[#allocation2 + $0x70] sm:$0xff] %vm418_vm0, %v1520_v0 }
  0x22   : > { %434 = vst.msk [vmem:[#allocation2 + $0x78] sm:$0xff] %vm418_vm0, %v1520_v0 }
  0x23 PF: > { %s435_s23 = sshra.s32 %s1509_s28, 7  ;;  %s440_s24 = sand.u32 127, %s1509_s28 }
  0x24   : > { %s1346_s25 = sshll.u32 %s435_s23, 7 }
  0x25   : > { %s441_s26 = sadd.s32 %s1346_s25, %s440_s24 }
  0x26   : > { %s442_s27 = sld [smem:[#allocation5 + %s441_s26]] }
  0x2c   : > { %p1347_p6 = scmp.eq.s32.totalorder %s442_s27, 0 }
  0x2e   : > { %446 = sbr.rel (%p1347_p6) target bundleno = 501 (0x1f5), region = 52 }
  0x33   : > { %v450_v1 = vlaneseq  ;;  %v452_v2 = vstv %s1509_s28  ;;  %v464_v3 = vld [vmem:[%s1979_s6 + $0x50] sm:$0xff]  ;;  %v462_v5 = vld [vmem:[%s1979_s6 + $0x40] sm:$0xff]  ;;  %v1437_v7 = vld [vmem:[%s1598_s15 + $0x8] sm:$0xff]  ;;  %vm486_vm1 = vcmask 31744   ;;  %vm700_vm3 = vcmask 261120  }
  0x34   : > { %v454_v6 = vld [vmem:[%s1979_s6] sm:$0xff]  ;;  %824 = vmatpush.bf16.msra.mxu0 %v1437_v7  ;;  %1443 = vmatpush.bf16.msra.mxu3 %v1437_v7  ;;  %v465_v13 = vld [vmem:[%s1979_s6 + $0x58] sm:$0xff]  ;;  %v463_v17 = vld [vmem:[%s1979_s6 + $0x48] sm:$0xff]  ;;  %v1521_v63 = vmov 0   ;;  %vm535_vm4 = vcmask 7168   ;;  %vm1051_vm5 = vcmask 523264  }
  0x35   : > { %v451_v4 = vand.u32 127, %v450_v1  ;;  %v1436_v9 = vld [vmem:[%s1598_s15] sm:$0xff]  ;;  %v455_v18 = vld [vmem:[%s1979_s6 + $0x8] sm:$0xff]  ;;  %v456_v27 = vld [vmem:[%s1979_s6 + $0x10] sm:$0xff]  ;;  %1478 = vset.pattern.permute.xlu1 %v1521_v63  ;;  %1476 = vset.pattern.permute.xlu2 %v1521_v63 }
  0x36   : > { %v1428_v19 = vld [vmem:[%s1974_s1] sm:$0xff]  ;;  %v457_v28 = vld [vmem:[%s1979_s6 + $0x18] sm:$0xff]  ;;  %v459_v35 = vld [vmem:[%s1979_s6 + $0x28] sm:$0xff]  ;;  %1477 = vset.pattern.permute.xlu0 %v1521_v63 }
  0x37   : > { %vm1639_vm2 = vcmp.eq.s32.totalorder %v451_v4, %v452_v2  ;;  %v466_v26 = vld [vmem:[%s1979_s6 + $0x60] sm:$0xff]  ;;  %v467_v36 = vld [vmem:[%s1979_s6 + $0x68] sm:$0xff]  ;;  %v468_v45 = vld [vmem:[%s1979_s6 + $0x70] sm:$0xff] }
  0x38   : > { %v480_v10 = vsel %vm1639_vm2, %v464_v3, 0.0  ;;  %v478_v11 = vsel %vm1639_vm2, %v462_v5, 0.0  ;;  %v470_v12 = vsel %vm1639_vm2, %v454_v6, 0.0  ;;  %825 = vmatpush.bf16.msra.mxu0 %v1436_v9  ;;  %v481_v20 = vsel %vm1639_vm2, %v465_v13, 0.0  ;;  %1444 = vmatpush.bf16.msra.mxu3 %v1436_v9  ;;  %v458_v37 = vld [vmem:[%s1979_s6 + $0x20] sm:$0xff]  ;;  %v1429_v38 = vld [vmem:[%s1974_s1 + $0x8] sm:$0xff] }
  0x39   : > { %v517_v14 = vsel %vm486_vm1, %v480_v10, 0.0  ;;  %v511_v15 = vsel %vm486_vm1, %v478_v11, 0.0  ;;  %v487_v16 = vsel %vm486_vm1, %v470_v12, 0.0  ;;  %v479_v21 = vsel %vm1639_vm2, %v463_v17, 0.0  ;;  %v469_v46 = vld [vmem:[%s1979_s6 + $0x78] sm:$0xff]  ;;  %v460_v51 = vld [vmem:[%s1979_s6 + $0x30] sm:$0xff] }
  0x3a   : > { %518 = vadd.xlane.f32.xlu2 %v517_v14  ;;  %512 = vadd.xlane.f32.xlu0 %v511_v15  ;;  %v471_v22 = vsel %vm1639_vm2, %v455_v18, 0.0  ;;  %v520_v23 = vsel %vm486_vm1, %v481_v20, 0.0  ;;  %v514_v24 = vsel %vm486_vm1, %v479_v21, 0.0  ;;  %v482_v29 = vsel %vm1639_vm2, %v466_v26, 0.0  ;;  %v1430_v52 = vld [vmem:[%s1974_s1 + $0x10] sm:$0xff]  ;;  %v1433_v54 = vld [vmem:[%s1974_s1 + $0x28] sm:$0xff] }
  0x3b   : > { %488 = vadd.xlane.f32.xlu1 %v487_v16  ;;  %1388 = vmatmul.msk.bf16.vlgmr.msra.gmra.mxu0 %vm700_vm3, %v1428_v19  ;;  %v490_v25 = vsel %vm486_vm1, %v471_v22, 0.0  ;;  %v472_v30 = vsel %vm1639_vm2, %v456_v27, 0.0  ;;  %v473_v31 = vsel %vm1639_vm2, %v457_v28, 0.0  ;;  %v523_v32 = vsel %vm486_vm1, %v482_v29, 0.0  ;;  %v461_v56 = vld [vmem:[%s1979_s6 + $0x38] sm:$0xff]  ;;  %v1434_v60 = vld [vmem:[%s1974_s1 + $0x30] sm:$0xff] }
  0x3c   : > { %v493_v33 = vsel %vm486_vm1, %v472_v30, 0.0  ;;  %v496_v34 = vsel %vm486_vm1, %v473_v31, 0.0  ;;  %v475_v39 = vsel %vm1639_vm2, %v459_v35, 0.0  ;;  %v483_v40 = vsel %vm1639_vm2, %v467_v36, 0.0  ;;  %1393 = vmatmul.msk.bf16.vlgmr.msra.gmra.mxu3 %vm700_vm3, %v1433_v54  ;;  %v1431_v59 = vld [vmem:[%s1974_s1 + $0x18] sm:$0xff]  ;;  %v1432_v61 = vld [vmem:[%s1974_s1 + $0x20] sm:$0xff] }
  0x3d   : > { %v474_v41 = vsel %vm1639_vm2, %v458_v37, 0.0  ;;  %v502_v42 = vsel %vm486_vm1, %v475_v39, 0.0  ;;  %v526_v43 = vsel %vm486_vm1, %v483_v40, 0.0  ;;  %v484_v47 = vsel %vm1639_vm2, %v468_v45, 0.0  ;;  %v1435_v62 = vld [vmem:[%s1974_s1 + $0x38] sm:$0xff]  ;;  %v1439_v40 = vld [vmem:[%s1604_s19 + $0x8] sm:$0xff] }
  0x3e   : > { %v499_v44 = vsel %vm486_vm1, %v474_v41, 0.0  ;;  %v485_v48 = vsel %vm1639_vm2, %v469_v46, 0.0  ;;  %v529_v49 = vsel %vm486_vm1, %v484_v47, 0.0  ;;  %v476_v53 = vsel %vm1639_vm2, %v460_v51, 0.0  ;;  %v1441_v37 = vld [vmem:[%s1604_s19 + $0x18] sm:$0xff]  ;;  %v1438_v41 = vld [vmem:[%s1604_s19] sm:$0xff] }
  0x3f   : > { %v532_v50 = vsel %vm486_vm1, %v485_v48, 0.0  ;;  %v505_v55 = vsel %vm486_vm1, %v476_v53, 0.0  ;;  %v477_v57 = vsel %vm1639_vm2, %v461_v56, 0.0  ;;  %1080 = vmatpush.bf16.msra.mxu1 %v1441_v37  ;;  %1445 = vmatpush.bf16.msra.mxu2 %v1441_v37  ;;  %v1810_v46 = vld [vmem:[%s385_s12] ss:$0 sm:$0xff] }
  0x40   : > { %v508_v58 = vsel %vm486_vm1, %v477_v57, 0.0  ;;  %v552_v37 = vld [vmem:[#allocation2] sm:$0xff] }
  0x42   : > { %521 = vadd.xlane.f32.xlu2 %v520_v23  ;;  %515 = vadd.xlane.f32.xlu0 %v514_v24 }
  0x43   : > { %491 = vadd.xlane.f32.xlu1 %v490_v25 }
  0x4a   : > { %524 = vadd.xlane.f32.xlu2 %v523_v32  ;;  %494 = vadd.xlane.f32.xlu0 %v493_v33 }
  0x4b   : > { %497 = vadd.xlane.f32.xlu1 %v496_v34  ;;  %1389 = vmatmul.msk.bf16.gmra.mxu0 %vm700_vm3, %v1429_v38  ;;  %v1440_v38 = vld [vmem:[%s1604_s19 + $0x10] sm:$0xff] }
  0x4c   : > { %1394 = vmatmul.msk.bf16.gmra.mxu3 %vm700_vm3, %v1434_v60  ;;  %1081 = vmatpush.bf16.msra.mxu1 %v1440_v38 }
  0x4d   : > { %1446 = vmatpush.bf16.msra.mxu2 %v1440_v38 }
  0x50   : > { %1082 = vmatpush.bf16.msra.mxu1 %v1439_v40 }
  0x51   : > { %1447 = vmatpush.bf16.msra.mxu2 %v1439_v40 }
  0x52   : > { %503 = vadd.xlane.f32.xlu2 %v502_v42  ;;  %527 = vadd.xlane.f32.xlu0 %v526_v43 }
  0x53   : > { %500 = vadd.xlane.f32.xlu1 %v499_v44 }
  0x54   : > { %1083 = vmatpush.bf16.msra.mxu1 %v1438_v41 }
  0x55   : > { %1448 = vmatpush.bf16.msra.mxu2 %v1438_v41 }
  0x5a   : > { %530 = vadd.xlane.f32.xlu0 %v529_v49 }
  0x5b   : > { %533 = vadd.xlane.f32.xlu1 %v532_v50  ;;  %1390 = vmatmul.msk.bf16.gmra.mxu0 %vm700_vm3, %v1430_v52 }
  0x5c   : > { %1395 = vmatmul.msk.bf16.gmra.mxu3 %vm700_vm3, %v1435_v62 }
  0x63   : > { %506 = vadd.xlane.f32.xlu1 %v505_v55 }
  0x6b   : > { %509 = vadd.xlane.f32.xlu1 %v508_v58  ;;  %1391 = vmatmul.msk.bf16.gmra.mxu0 %vm700_vm3, %v1431_v59 }
  0x7b   : > { %1392 = vmatmul.msk.bf16.gmra.mxu0 %vm700_vm3, %v1432_v61 }
  0xad   : > { %v519_v0 = vpop.xlane.xlu2 %518  ;;  %v513_v1 = vpop.xlane.xlu0 %512 }
  0xae   : > { %546 = vst.msk [vmem:[#allocation3 + $0x50] sm:$0xff] %vm535_vm4, %v519_v0  ;;  %v489_v2 = vpop.xlane.xlu1 %488 }
  0xaf   : > { %544 = vst.msk [vmem:[#allocation3 + $0x40] sm:$0xff] %vm535_vm4, %v513_v1 }
  0xb0   : > { %536 = vst.msk [vmem:[#allocation3] sm:$0xff] %vm535_vm4, %v489_v2 }
  0xb5   : > { %v522_v3 = vpop.xlane.xlu2 %521  ;;  %v516_v4 = vpop.xlane.xlu0 %515  ;;  %v893_v16 = vld [vmem:[#allocation3 + $0x50] sm:$0xff] }
  0xb6   : > { %547 = vst.msk [vmem:[#allocation3 + $0x58] sm:$0xff] %vm535_vm4, %v522_v3  ;;  %v492_v5 = vpop.xlane.xlu1 %491  ;;  %v1767_v6 = vld [vmem:[#allocation3 + $0x40] sm:$0xff] }
  0xb7   : > { %545 = vst.msk [vmem:[#allocation3 + $0x48] sm:$0xff] %vm535_vm4, %v516_v4  ;;  %941 = vperm.xlu2 %1476, %v1767_v6   ;;  %v883_v7 = vld [vmem:[#allocation3] sm:$0xff] }
  0xb8   : > { %537 = vst.msk [vmem:[#allocation3 + $0x8] sm:$0xff] %vm535_vm4, %v492_v5  ;;  %901 = vperm.xlu1 %1478, %v883_v7   ;;  %v827_v24 = vpop.f32.mrf.mxu0 }
  0xb9   : > { %v828_v49 = vadd.f32 %v1810_v46, %v827_v24 }
  0xbb   : > { %v867_v52 = vmax.f32 %v828_v49, 0.0 }
  0xbd   : > { %v525_v8 = vpop.xlane.xlu2 %524  ;;  %v495_v9 = vpop.xlane.xlu0 %494  ;;  %v894_v21 = vld [vmem:[#allocation3 + $0x58] sm:$0xff] }
  0xbe   : > { %548 = vst.msk [vmem:[#allocation3 + $0x60] sm:$0xff] %vm535_vm4, %v525_v8  ;;  %v498_v10 = vpop.xlane.xlu1 %497  ;;  %v1773_v11 = vld [vmem:[#allocation3 + $0x48] sm:$0xff] }
  0xbf   : > { %538 = vst.msk [vmem:[#allocation3 + $0x10] sm:$0xff] %vm535_vm4, %v495_v9  ;;  %946 = vperm.xlu0 %1477, %v1773_v11   ;;  %v884_v12 = vld [vmem:[#allocation3 + $0x8] sm:$0xff]  ;;  %v852_v51 = vpop.f32.mrf.mxu3 }
  0xc0   : > { %539 = vst.msk [vmem:[#allocation3 + $0x18] sm:$0xff] %vm535_vm4, %v498_v10  ;;  %906 = vperm.xlu2 %1476, %v884_v12   ;;  %v829_v28 = vpop.f32.mrf.mxu0 }
  0xc1   : > { %v830_v50 = vadd.f32 %v1810_v46, %v829_v28 }
  0xc3   : > { %v868_v53 = vmax.f32 %v830_v50, 0.0 }
  0xc5   : > { %v504_v13 = vpop.xlane.xlu2 %503  ;;  %v528_v14 = vpop.xlane.xlu0 %527  ;;  %v1778_v15 = vld [vmem:[#allocation3 + $0x60] sm:$0xff] }
  0xc6   : > { %541 = vst.msk [vmem:[#allocation3 + $0x28] sm:$0xff] %vm535_vm4, %v504_v13  ;;  %v501_v17 = vpop.xlane.xlu1 %500  ;;  %v885_v18 = vld [vmem:[#allocation3 + $0x10] sm:$0xff]  ;;  %961 = vperm.xlu1 %1478, %v1778_v15   ;;  %v853_v13 = vadd.f32 %v1810_v46, %v852_v51 }
  0xc7   : > { %549 = vst.msk [vmem:[#allocation3 + $0x68] sm:$0xff] %vm535_vm4, %v528_v14  ;;  %911 = vperm.xlu0 %1477, %v885_v18   ;;  %v886_v27 = vld [vmem:[#allocation3 + $0x18] sm:$0xff]  ;;  %v854_v63 = vpop.f32.mrf.mxu3 }
  0xc8   : > { %540 = vst.msk [vmem:[#allocation3 + $0x20] sm:$0xff] %vm535_vm4, %v501_v17  ;;  %951 = vperm.xlu2 %1476, %v893_v16   ;;  %v1788_v32 = vpop.f32.mrf.mxu0  ;;  %v855_v10 = vadd.f32 %v1810_v46, %v854_v63 }
  0xc9   : > { %v833_v5 = vadd.f32 %v1810_v46, %v1788_v32 }
  0xca   : > { %v878_v17 = vmax.f32 %v855_v10, 0.0 }
  0xcb   : > { %v869_v8 = vmax.f32 %v833_v5, 0.0 }
  0xcd   : > { %v531_v19 = vpop.xlane.xlu0 %530  ;;  %v888_v20 = vld [vmem:[#allocation3 + $0x28] sm:$0xff] }
  0xce   : > { %550 = vst.msk [vmem:[#allocation3 + $0x70] sm:$0xff] %vm535_vm4, %v531_v19  ;;  %v534_v22 = vpop.xlane.xlu1 %533  ;;  %v896_v23 = vld [vmem:[#allocation3 + $0x68] sm:$0xff]  ;;  %926 = vperm.xlu1 %1478, %v888_v20  }
  0xcf   : > { %551 = vst.msk [vmem:[#allocation3 + $0x78] sm:$0xff] %vm535_vm4, %v534_v22  ;;  %966 = vperm.xlu0 %1477, %v896_v23   ;;  %v887_v31 = vld [vmem:[#allocation3 + $0x20] sm:$0xff] }
  0xd0   : > { %956 = vperm.xlu2 %1476, %v894_v21   ;;  %v834_v35 = vpop.f32.mrf.mxu0 }
  0xd5   : > { %v897_v25 = vld [vmem:[#allocation3 + $0x70] sm:$0xff] }
  0xd6   : > { %v507_v26 = vpop.xlane.xlu1 %506  ;;  %v898_v34 = vld [vmem:[#allocation3 + $0x78] sm:$0xff] }
  0xd7   : > { %542 = vst.msk [vmem:[#allocation3 + $0x30] sm:$0xff] %vm535_vm4, %v507_v26  ;;  %971 = vperm.xlu0 %1477, %v897_v25  }
  0xd8   : > { %916 = vperm.xlu2 %1476, %v886_v27   ;;  %v1790_v36 = vpop.f32.mrf.mxu0 }
  0xde   : > { %v510_v29 = vpop.xlane.xlu1 %509  ;;  %v889_v30 = vld [vmem:[#allocation3 + $0x30] sm:$0xff] }
  0xdf   : > { %543 = vst.msk [vmem:[#allocation3 + $0x38] sm:$0xff] %vm535_vm4, %v510_v29  ;;  %931 = vperm.xlu1 %1478, %v889_v30  }
  0xe0   : > { %921 = vperm.xlu2 %1476, %v887_v31   ;;  %v1795_v39 = vpop.f32.mrf.mxu0 }
  0xe1   : > { %v840_v24 = vadd.f32 %v1810_v46, %v1795_v39 }
  0xe3   : > { %v872_v29 = vmax.f32 %v840_v24, 0.0 }
  0xe6   : > { %v890_v33 = vld [vmem:[#allocation3 + $0x38] sm:$0xff] }
  0xe7   : > { %592 = vperm.xlu1 %1478, %v884_v12   ;;  %936 = vperm.xlu0 %1477, %v890_v33  }
  0xe8   : > { %976 = vperm.xlu2 %1476, %v898_v34   ;;  %v1800_v42 = vpop.f32.mrf.mxu0 }
  0xef   : > { %607 = vperm.xlu1 %1478, %v887_v31   ;;  %597 = vperm.xlu0 %1477, %v885_v18   ;;  %v1836_v31 = vld [vmem:[%s398_s22] ss:$0 sm:$0xff] }
  0xf0   : > { %587 = vperm.xlu2 %1476, %v883_v7   ;;  %v1803_v44 = vpop.f32.mrf.mxu0 }
  0xf7   : > { %612 = vperm.xlu0 %1477, %v888_v20   ;;  %622 = vperm.xlu1 %1478, %v890_v33   ;;  %v877_v20 = vmax.f32 %v853_v13, 0.0 }
  0xf8   : > { %602 = vperm.xlu2 %1476, %v886_v27   ;;  %v847_v47 = vpop.f32.mrf.mxu0  ;;  %v838_v27 = vadd.f32 %v1810_v46, %v1790_v36 }
  0xf9   : > { %v848_v55 = vadd.f32 %v1810_v46, %v847_v47 }
  0xfa   : > { %v871_v33 = vmax.f32 %v838_v27, 0.0 }
  0xfb   : > { %v875_v62 = vmax.f32 %v848_v55, 0.0  ;;  %v843_v55 = vadd.f32 %v1810_v46, %v1800_v42 }
  0xff   : > { %627 = vperm.xlu0 %1477, %v1767_v6   ;;  %637 = vperm.xlu1 %1478, %v893_v16   ;;  %v835_v6 = vadd.f32 %v1810_v46, %v834_v35 }
 0x100   : > { %617 = vperm.xlu2 %1476, %v889_v30   ;;  %v849_v54 = vpop.f32.mrf.mxu0 }
 0x101   : > { %v850_v60 = vadd.f32 %v1810_v46, %v849_v54  ;;  %v870_v9 = vmax.f32 %v835_v6, 0.0 }
 0x103   : > { %v876_v0 = vmax.f32 %v850_v60, 0.0  ;;  %v873_v60 = vmax.f32 %v843_v55, 0.0 }
 0x107   : > { %642 = vperm.xlu0 %1477, %v894_v21   ;;  %652 = vperm.xlu1 %1478, %v896_v23  }
 0x108   : > { %632 = vperm.xlu2 %1476, %v1773_v11   ;;  %v857_v11 = vpop.f32.mrf.mxu3 }
 0x109   : > { %v858_v35 = vadd.f32 %v1810_v46, %v857_v11 }
 0x10b   : > { %v879_v47 = vmax.f32 %v858_v35, 0.0 }
 0x10f   : > { %657 = vperm.xlu0 %1477, %v897_v25  }
 0x110   : > { %647 = vperm.xlu2 %1476, %v1778_v15   ;;  %v859_v25 = vpop.f32.mrf.mxu3 }
 0x111   : > { %v942_v43 = vpop.permute.xlu2 %941  ;;  %v860_v32 = vadd.f32 %v1810_v46, %v859_v25 }
 0x112   : > { %v987_v2 = vmul.f32 %v942_v43, %v875_v62 }
 0x113   : > { %v880_v40 = vmax.f32 %v860_v32, 0.0 }
 0x118   : > { %662 = vperm.xlu2 %1476, %v898_v34   ;;  %v862_v41 = vpop.f32.mrf.mxu3 }
 0x119   : > { %v863_v62 = vadd.f32 %v1810_v46, %v862_v41  ;;  %v562_v41 = vld [vmem:[#allocation2 + $0x50] sm:$0xff] }
 0x11a   : > { %v907_v45 = vpop.permute.xlu2 %906 }
 0x11b   : > { %v980_v58 = vmul.f32 %v907_v45, %v868_v53 }
 0x122   : > { %v952_v48 = vpop.permute.xlu2 %951 }
 0x123   : > { %v989_v22 = vmul.f32 %v952_v48, %v877_v20 }
 0x12a   : > { %v957_v56 = vpop.permute.xlu2 %956  ;;  %v902_v57 = vpop.permute.xlu1 %901 }
 0x12b   : > { %v979_v59 = vmul.f32 %v902_v57, %v867_v52  ;;  %v990_v21 = vmul.f32 %v957_v56, %v878_v17  ;;  %v555_v52 = vld [vmem:[#allocation2 + $0x18] sm:$0xff]  ;;  %v845_v56 = vadd.f32 %v1810_v46, %v1803_v44  ;;  %v561_v17 = vld [vmem:[#allocation2 + $0x48] sm:$0xff] }
 0x12d   : > { %v995_v61 = vpack.c.bf16 %v980_v58, %v979_v59  ;;  %v1000_v26 = vpack.c.bf16 %v990_v21, %v989_v22  ;;  %v864_v59 = vpop.f32.mrf.mxu3 }
 0x12f   : > { %1412 = vmatmul.msk.bf16.vlgmr.msra.gmra.mxu1 %vm1051_vm5, %v995_v61  ;;  %v874_v61 = vmax.f32 %v845_v56, 0.0  ;;  %v565_v56 = vld [vmem:[#allocation2 + $0x68] sm:$0xff] }
 0x131   : > { %v947_v1 = vpop.permute.xlu0 %946 }
 0x132   : > { %v988_v3 = vmul.f32 %v947_v1, %v876_v0  ;;  %v917_v4 = vpop.permute.xlu2 %916  ;;  %v553_v0 = vld [vmem:[#allocation2 + $0x8] sm:$0xff] }
 0x133   : > { %v982_v14 = vmul.f32 %v917_v4, %v870_v9 }
 0x134   : > { %v999_v7 = vpack.c.bf16 %v988_v3, %v987_v2  ;;  %v865_v2 = vadd.f32 %v1810_v46, %v864_v59  ;;  %v558_v3 = vld [vmem:[#allocation2 + $0x30] sm:$0xff] }
 0x136   : > { %1416 = vmatmul.msk.bf16.vlgmr.msra.gmra.mxu2 %vm1051_vm5, %v999_v7  ;;  %v881_v7 = vmax.f32 %v863_v62, 0.0  ;;  %v882_v11 = vmax.f32 %v865_v2, 0.0  ;;  %v566_v62 = vld [vmem:[#allocation2 + $0x70] sm:$0xff] }
 0x138   : > { %v962_v19 = vpop.permute.xlu1 %961 }
 0x139   : > { %v912_v12 = vpop.permute.xlu0 %911  ;;  %v991_v51 = vmul.f32 %v962_v19, %v879_v47 }
 0x13a   : > { %v981_v15 = vmul.f32 %v912_v12, %v869_v8  ;;  %v922_v16 = vpop.permute.xlu2 %921  ;;  %v554_v12 = vld [vmem:[#allocation2 + $0x10] sm:$0xff] }
 0x13b   : > { %v983_v36 = vmul.f32 %v922_v16, %v871_v33 }
 0x13c   : > { %v996_v18 = vpack.c.bf16 %v982_v14, %v981_v15  ;;  %v556_v14 = vld [vmem:[#allocation2 + $0x20] sm:$0xff] }
 0x13f   : > { %1413 = vmatmul.msk.bf16.gmra.mxu1 %vm1051_vm5, %v996_v18 }
 0x140   : > { %v927_v28 = vpop.permute.xlu1 %926 }
 0x141   : > { %v967_v30 = vpop.permute.xlu0 %966  ;;  %v984_v34 = vmul.f32 %v927_v28, %v872_v29  ;;  %v559_v28 = vld [vmem:[#allocation2 + $0x38] sm:$0xff] }
 0x142   : > { %v1824_v23 = vpop.permute.xlu2 %976  ;;  %v992_v48 = vmul.f32 %v967_v30, %v880_v40  ;;  %v564_v30 = vld [vmem:[#allocation2 + $0x60] sm:$0xff] }
 0x143   : > { %v997_v43 = vpack.c.bf16 %v984_v34, %v983_v36  ;;  %v994_v16 = vmul.f32 %v1824_v23, %v882_v11  ;;  %v557_v23 = vld [vmem:[#allocation2 + $0x28] sm:$0xff] }
 0x144   : > { %v1001_v57 = vpack.c.bf16 %v992_v48, %v991_v51 }
 0x146   : > { %1417 = vmatmul.msk.bf16.gmra.mxu2 %vm1051_vm5, %v1000_v26 }
 0x149   : > { %v972_v49 = vpop.permute.xlu0 %971 }
 0x14a   : > { %v588_v38 = vpop.permute.xlu2 %587  ;;  %v993_v46 = vmul.f32 %v972_v49, %v881_v7 }
 0x14b   : > { %v668_v39 = vmul.f32 %v1836_v31, %v588_v38 }
 0x14c   : > { %v1002_v22 = vpack.c.bf16 %v994_v16, %v993_v46 }
 0x14d   : > { %v684_v45 = vadd.f32 %v668_v39, %v552_v37  ;;  %v560_v39 = vld [vmem:[#allocation2 + $0x40] sm:$0xff] }
 0x14f   : > { %701 = vst.msk [vmem:[#allocation2] sm:$0xff] %vm700_vm3, %v684_v45  ;;  %1414 = vmatmul.msk.bf16.gmra.mxu1 %vm1051_vm5, %v997_v43  ;;  %v567_v45 = vld [vmem:[#allocation2 + $0x78] sm:$0xff] }
 0x151   : > { %v932_v50 = vpop.permute.xlu1 %931 }
 0x152   : > { %v603_v53 = vpop.permute.xlu2 %602  ;;  %v985_v42 = vmul.f32 %v932_v50, %v873_v60 }
 0x153   : > { %v671_v54 = vmul.f32 %v1836_v31, %v603_v53 }
 0x155   : > { %v687_v58 = vadd.f32 %v671_v54, %v555_v52  ;;  %v563_v54 = vld [vmem:[#allocation2 + $0x58] sm:$0xff] }
 0x156   : > { %1418 = vmatmul.msk.bf16.gmra.mxu2 %vm1051_vm5, %v1001_v57  ;;  %v1003_v2 = vld [vmem:[#allocation2] sm:$0xff] }
 0x157   : > { %704 = vst.msk [vmem:[#allocation2 + $0x18] sm:$0xff] %vm700_vm3, %v687_v58 }
 0x159   : > { %v937_v63 = vpop.permute.xlu0 %936  ;;  %v593_v1 = vpop.permute.xlu1 %592 }
 0x15a   : > { %v618_v4 = vpop.permute.xlu2 %617  ;;  %v986_v44 = vmul.f32 %v937_v63, %v874_v61  ;;  %v669_v5 = vmul.f32 %v1836_v31, %v593_v1 }
 0x15b   : > { %v674_v6 = vmul.f32 %v1836_v31, %v618_v4 }
 0x15c   : > { %v998_v8 = vpack.c.bf16 %v986_v44, %v985_v42  ;;  %v685_v9 = vadd.f32 %v669_v5, %v553_v0 }
 0x15d   : > { %v690_v10 = vadd.f32 %v674_v6, %v558_v3 }
 0x15e   : > { %702 = vst.msk [vmem:[#allocation2 + $0x8] sm:$0xff] %vm700_vm3, %v685_v9 }
 0x15f   : > { %707 = vst.msk [vmem:[#allocation2 + $0x30] sm:$0xff] %vm700_vm3, %v690_v10  ;;  %1415 = vmatmul.msk.bf16.gmra.mxu1 %vm1051_vm5, %v998_v8 }
 0x161   : > { %v598_v13 = vpop.permute.xlu0 %597  ;;  %v608_v15 = vpop.permute.xlu1 %607 }
 0x162   : > { %v633_v18 = vpop.permute.xlu2 %632  ;;  %v670_v19 = vmul.f32 %v1836_v31, %v598_v13  ;;  %v672_v20 = vmul.f32 %v1836_v31, %v608_v15  ;;  %v1006_v13 = vld [vmem:[#allocation2 + $0x18] sm:$0xff] }
 0x163   : > { %v677_v21 = vmul.f32 %v1836_v31, %v633_v18 }
 0x164   : > { %v686_v24 = vadd.f32 %v670_v19, %v554_v12  ;;  %v688_v25 = vadd.f32 %v672_v20, %v556_v14 }
 0x165   : > { %v693_v26 = vadd.f32 %v677_v21, %v561_v17  ;;  %v1004_v4 = vld [vmem:[#allocation2 + $0x8] sm:$0xff] }
 0x166   : > { %703 = vst.msk [vmem:[#allocation2 + $0x10] sm:$0xff] %vm700_vm3, %v686_v24  ;;  %1419 = vmatmul.msk.bf16.gmra.mxu2 %vm1051_vm5, %v1002_v22 }
 0x167   : > { %710 = vst.msk [vmem:[#allocation2 + $0x48] sm:$0xff] %vm700_vm3, %v693_v26 }
 0x168   : > { %705 = vst.msk [vmem:[#allocation2 + $0x20] sm:$0xff] %vm700_vm3, %v688_v25 }
 0x169   : > { %v613_v27 = vpop.permute.xlu0 %612  ;;  %v623_v29 = vpop.permute.xlu1 %622 }
 0x16a   : > { %v648_v32 = vpop.permute.xlu2 %647  ;;  %v673_v33 = vmul.f32 %v1836_v31, %v613_v27  ;;  %v675_v34 = vmul.f32 %v1836_v31, %v623_v29 }
 0x16b   : > { %v680_v35 = vmul.f32 %v1836_v31, %v648_v32  ;;  %v1009_v32 = vld [vmem:[#allocation2 + $0x30] sm:$0xff] }
 0x16c   : > { %v689_v37 = vadd.f32 %v673_v33, %v557_v23  ;;  %v691_v38 = vadd.f32 %v675_v34, %v559_v28 }
 0x16d   : > { %v696_v36 = vadd.f32 %v680_v35, %v564_v30  ;;  %v1005_v9 = vld [vmem:[#allocation2 + $0x10] sm:$0xff] }
 0x16e   : > { %706 = vst.msk [vmem:[#allocation2 + $0x28] sm:$0xff] %vm700_vm3, %v689_v37  ;;  %v1012_v11 = vld [vmem:[#allocation2 + $0x48] sm:$0xff] }
 0x16f   : > { %713 = vst.msk [vmem:[#allocation2 + $0x60] sm:$0xff] %vm700_vm3, %v696_v36  ;;  %v1007_v19 = vld [vmem:[#allocation2 + $0x20] sm:$0xff] }
 0x170   : > { %708 = vst.msk [vmem:[#allocation2 + $0x38] sm:$0xff] %vm700_vm3, %v691_v38 }
 0x171   : > { %v628_v40 = vpop.permute.xlu0 %627  ;;  %v638_v43 = vpop.permute.xlu1 %637 }
 0x172   : > { %v663_v47 = vpop.permute.xlu2 %662  ;;  %v676_v48 = vmul.f32 %v1836_v31, %v628_v40  ;;  %v678_v49 = vmul.f32 %v1836_v31, %v638_v43 }
 0x173   : > { %v683_v50 = vmul.f32 %v1836_v31, %v663_v47 }
 0x174   : > { %v692_v51 = vadd.f32 %v676_v48, %v560_v39  ;;  %v694_v52 = vadd.f32 %v678_v49, %v562_v41 }
 0x175   : > { %v699_v53 = vadd.f32 %v683_v50, %v567_v45  ;;  %v1008_v26 = vld [vmem:[#allocation2 + $0x28] sm:$0xff] }
 0x176   : > { %709 = vst.msk [vmem:[#allocation2 + $0x40] sm:$0xff] %vm700_vm3, %v692_v51  ;;  %v1015_v28 = vld [vmem:[#allocation2 + $0x60] sm:$0xff] }
 0x177   : > { %716 = vst.msk [vmem:[#allocation2 + $0x78] sm:$0xff] %vm700_vm3, %v699_v53  ;;  %v1010_v36 = vld [vmem:[#allocation2 + $0x38] sm:$0xff] }
 0x178   : > { %711 = vst.msk [vmem:[#allocation2 + $0x50] sm:$0xff] %vm700_vm3, %v694_v52 }
 0x179   : > { %v643_v55 = vpop.permute.xlu0 %642  ;;  %v653_v57 = vpop.permute.xlu1 %652 }
 0x17a   : > { %v679_v58 = vmul.f32 %v1836_v31, %v643_v55  ;;  %v681_v59 = vmul.f32 %v1836_v31, %v653_v57 }
 0x17c   : > { %v695_v60 = vadd.f32 %v679_v58, %v563_v54  ;;  %v697_v61 = vadd.f32 %v681_v59, %v565_v56 }
 0x17d   : > { %v1011_v6 = vld [vmem:[#allocation2 + $0x40] sm:$0xff] }
 0x17e   : > { %712 = vst.msk [vmem:[#allocation2 + $0x58] sm:$0xff] %vm700_vm3, %v695_v60  ;;  %v1018_v47 = vld [vmem:[#allocation2 + $0x78] sm:$0xff] }
 0x17f   : > { %714 = vst.msk [vmem:[#allocation2 + $0x68] sm:$0xff] %vm700_vm3, %v697_v61  ;;  %v1013_v16 = vld [vmem:[#allocation2 + $0x50] sm:$0xff] }
 0x181   : > { %v658_v63 = vpop.permute.xlu0 %657 }
 0x182   : > { %v682_v0 = vmul.f32 %v1836_v31, %v658_v63 }
 0x184   : > { %v698_v1 = vadd.f32 %v682_v0, %v566_v62 }
 0x185   : > { %v1014_v22 = vld [vmem:[#allocation2 + $0x58] sm:$0xff] }
 0x186   : > { %715 = vst.msk [vmem:[#allocation2 + $0x70] sm:$0xff] %vm700_vm3, %v698_v1  ;;  %v1016_v35 = vld [vmem:[#allocation2 + $0x68] sm:$0xff] }
 0x18d   : > { %v1017_v41 = vld [vmem:[#allocation2 + $0x70] sm:$0xff] }
 0x1ac   : > { %v1085_v42 = vpop.f32.mrf.mxu1 }
 0x1ad   : > { %v1125_v3 = vadd.f32 %v1085_v42, %v1003_v2 }
 0x1af   : > { %1141 = vst.msk [vmem:[#allocation2] sm:$0xff] %vm700_vm3, %v1125_v3 }
 0x1b4   : > { %v1087_v44 = vpop.f32.mrf.mxu1 }
 0x1b5   : > { %v1126_v5 = vadd.f32 %v1087_v44, %v1004_v4 }
 0x1b7   : > { %1142 = vst.msk [vmem:[#allocation2 + $0x8] sm:$0xff] %vm700_vm3, %v1126_v5 }
 0x1b9   : > { %v1105_v7 = vpop.f32.mrf.mxu2 }
 0x1ba   : > { %v1133_v8 = vadd.f32 %v1105_v7, %v1011_v6 }
 0x1bc   : > { %1149 = vst.msk [vmem:[#allocation2 + $0x40] sm:$0xff] %vm700_vm3, %v1133_v8  ;;  %v1090_v31 = vpop.f32.mrf.mxu1 }
 0x1bd   : > { %v1127_v10 = vadd.f32 %v1090_v31, %v1005_v9 }
 0x1bf   : > { %1143 = vst.msk [vmem:[#allocation2 + $0x10] sm:$0xff] %vm700_vm3, %v1127_v10 }
 0x1c1   : > { %v1107_v46 = vpop.f32.mrf.mxu2 }
 0x1c2   : > { %v1134_v12 = vadd.f32 %v1107_v46, %v1012_v11 }
 0x1c4   : > { %1150 = vst.msk [vmem:[#allocation2 + $0x48] sm:$0xff] %vm700_vm3, %v1134_v12  ;;  %v1092_v14 = vpop.f32.mrf.mxu1 }
 0x1c5   : > { %v1128_v15 = vadd.f32 %v1092_v14, %v1006_v13 }
 0x1c7   : > { %1144 = vst.msk [vmem:[#allocation2 + $0x18] sm:$0xff] %vm700_vm3, %v1128_v15 }
 0x1c9   : > { %v1110_v17 = vpop.f32.mrf.mxu2 }
 0x1ca   : > { %v1135_v18 = vadd.f32 %v1110_v17, %v1013_v16 }
 0x1cc   : > { %1151 = vst.msk [vmem:[#allocation2 + $0x50] sm:$0xff] %vm700_vm3, %v1135_v18  ;;  %v1095_v20 = vpop.f32.mrf.mxu1 }
 0x1cd   : > { %v1129_v21 = vadd.f32 %v1095_v20, %v1007_v19 }
 0x1cf   : > { %1145 = vst.msk [vmem:[#allocation2 + $0x20] sm:$0xff] %vm700_vm3, %v1129_v21 }
 0x1d1   : > { %v1112_v24 = vpop.f32.mrf.mxu2 }
 0x1d2   : > { %v1136_v25 = vadd.f32 %v1112_v24, %v1014_v22 }
 0x1d4   : > { %1152 = vst.msk [vmem:[#allocation2 + $0x58] sm:$0xff] %vm700_vm3, %v1136_v25  ;;  %v1097_v23 = vpop.f32.mrf.mxu1 }
 0x1d5   : > { %v1130_v27 = vadd.f32 %v1097_v23, %v1008_v26 }
 0x1d7   : > { %1146 = vst.msk [vmem:[#allocation2 + $0x28] sm:$0xff] %vm700_vm3, %v1130_v27 }
 0x1d9   : > { %v1115_v29 = vpop.f32.mrf.mxu2 }
 0x1da   : > { %v1137_v30 = vadd.f32 %v1115_v29, %v1015_v28 }
 0x1dc   : > { %1153 = vst.msk [vmem:[#allocation2 + $0x60] sm:$0xff] %vm700_vm3, %v1137_v30  ;;  %v1100_v33 = vpop.f32.mrf.mxu1 }
 0x1dd   : > { %v1131_v34 = vadd.f32 %v1100_v33, %v1009_v32 }
 0x1df   : > { %1147 = vst.msk [vmem:[#allocation2 + $0x30] sm:$0xff] %vm700_vm3, %v1131_v34 }
 0x1e1   : > { %v1117_v37 = vpop.f32.mrf.mxu2 }
 0x1e2   : > { %v1138_v38 = vadd.f32 %v1117_v37, %v1016_v35 }
 0x1e4   : > { %1154 = vst.msk [vmem:[#allocation2 + $0x68] sm:$0xff] %vm700_vm3, %v1138_v38  ;;  %v1102_v39 = vpop.f32.mrf.mxu1 }
 0x1e5   : > { %v1132_v40 = vadd.f32 %v1102_v39, %v1010_v36 }
 0x1e7   : > { %1148 = vst.msk [vmem:[#allocation2 + $0x38] sm:$0xff] %vm700_vm3, %v1132_v40 }
 0x1e9   : > { %v1120_v43 = vpop.f32.mrf.mxu2 }
 0x1ea   : > { %v1139_v45 = vadd.f32 %v1120_v43, %v1017_v41 }
 0x1ec   : > { %1155 = vst.msk [vmem:[#allocation2 + $0x70] sm:$0xff] %vm700_vm3, %v1139_v45 }
 0x1f1   : > { %v1122_v48 = vpop.f32.mrf.mxu2 }
 0x1f2   : > { %v1140_v49 = vadd.f32 %v1122_v48, %v1018_v47 }
 0x1f4   : > { %1156 = vst.msk [vmem:[#allocation2 + $0x78] sm:$0xff] %vm700_vm3, %v1140_v49 }
 0x1f5 PF: > { %p1157_p7 = scmp.eq.s32.totalorder %s1509_s28, 3 }
 0x1f6   : > { %v1162_v50 = vld [vmem:[#allocation2] sm:$0xff] (%p1157_p7)  ;;  %vm1178_vm6 = vcmask (%p1157_p7), 261120   ;;  %v1163_v51 = vld [vmem:[#allocation2 + $0x8] sm:$0xff] (%p1157_p7)  ;;  %v1164_v52 = vld [vmem:[#allocation2 + $0x10] sm:$0xff] (%p1157_p7) }
 0x1f7   : > { %1161 = sbr.rel (!%p1157_p7) target bundleno = 519 (0x207), region = 60  ;;  %1179 = vst.msk [vmem:[%s1980_s7] sm:$0xff] (%p1157_p7), %vm1178_vm6, %v1162_v50  ;;  %v1165_v53 = vld [vmem:[#allocation2 + $0x18] sm:$0xff] (%p1157_p7)  ;;  %v1166_v54 = vld [vmem:[#allocation2 + $0x20] sm:$0xff] (%p1157_p7)  ;;  %v1167_v55 = vld [vmem:[#allocation2 + $0x28] sm:$0xff] (%p1157_p7) }
 0x1f8   : > { %1180 = vst.msk [vmem:[%s1980_s7 + $0x8] sm:$0xff] (%p1157_p7), %vm1178_vm6, %v1163_v51  ;;  %v1168_v56 = vld [vmem:[#allocation2 + $0x30] sm:$0xff] (%p1157_p7)  ;;  %v1169_v57 = vld [vmem:[#allocation2 + $0x38] sm:$0xff] (%p1157_p7)  ;;  %v1170_v58 = vld [vmem:[#allocation2 + $0x40] sm:$0xff] (%p1157_p7) }
 0x1f9   : > { %1181 = vst.msk [vmem:[%s1980_s7 + $0x10] sm:$0xff] (%p1157_p7), %vm1178_vm6, %v1164_v52  ;;  %v1171_v59 = vld [vmem:[#allocation2 + $0x48] sm:$0xff] (%p1157_p7)  ;;  %v1172_v60 = vld [vmem:[#allocation2 + $0x50] sm:$0xff] (%p1157_p7)  ;;  %v1173_v61 = vld [vmem:[#allocation2 + $0x58] sm:$0xff] (%p1157_p7) }
 0x1fa   : > { %1182 = vst.msk [vmem:[%s1980_s7 + $0x18] sm:$0xff] (%p1157_p7), %vm1178_vm6, %v1165_v53  ;;  %v1174_v62 = vld [vmem:[#allocation2 + $0x60] sm:$0xff] (%p1157_p7)  ;;  %v1175_v63 = vld [vmem:[#allocation2 + $0x68] sm:$0xff] (%p1157_p7)  ;;  %v1176_v0 = vld [vmem:[#allocation2 + $0x70] sm:$0xff] (%p1157_p7) }
 0x1fb   : > { %1183 = vst.msk [vmem:[%s1980_s7 + $0x20] sm:$0xff] (%p1157_p7), %vm1178_vm6, %v1166_v54  ;;  %v1177_v1 = vld [vmem:[#allocation2 + $0x78] sm:$0xff] (%p1157_p7) }
 0x1fc   : > { %1184 = vst.msk [vmem:[%s1980_s7 + $0x28] sm:$0xff] %vm1178_vm6, %v1167_v55 }
 0x1fd   : > { %1185 = vst.msk [vmem:[%s1980_s7 + $0x30] sm:$0xff] %vm1178_vm6, %v1168_v56 }
 0x1fe   : > { %1186 = vst.msk [vmem:[%s1980_s7 + $0x38] sm:$0xff] %vm1178_vm6, %v1169_v57 }
 0x1ff   : > { %1187 = vst.msk [vmem:[%s1980_s7 + $0x40] sm:$0xff] %vm1178_vm6, %v1170_v58 }
 0x200   : > { %1188 = vst.msk [vmem:[%s1980_s7 + $0x48] sm:$0xff] %vm1178_vm6, %v1171_v59 }
 0x201   : > { %1189 = vst.msk [vmem:[%s1980_s7 + $0x50] sm:$0xff] %vm1178_vm6, %v1172_v60 }
 0x202   : > { %1190 = vst.msk [vmem:[%s1980_s7 + $0x58] sm:$0xff] %vm1178_vm6, %v1173_v61 }
 0x203   : > { %1191 = vst.msk [vmem:[%s1980_s7 + $0x60] sm:$0xff] %vm1178_vm6, %v1174_v62 }
 0x204   : > { %1192 = vst.msk [vmem:[%s1980_s7 + $0x68] sm:$0xff] %vm1178_vm6, %v1175_v63 }
 0x205   : > { %1193 = vst.msk [vmem:[%s1980_s7 + $0x70] sm:$0xff] %vm1178_vm6, %v1176_v0 }
 0x206   : > { %1194 = vst.msk [vmem:[%s1980_s7 + $0x78] sm:$0xff] %vm1178_vm6, %v1177_v1 }
 0x207 PF: > { %s25_s30 = sadd.s32 1, %s1517_s30   ;;  %s1983_s28 = smov %s1513_s29 }
 0x208   : > { %p22_p8 = scmp.ge.s32.totalorder %s25_s30, 6   ;;  %s1984_s29 = smov %s1986_s0 }
 0x20a   :  { %24 = sbr.rel (!%p22_p8) target bundleno = 8 (0x8), region = 105 }

</bundles_post_ra>
